<compile_context>
chip_gen: v5e
topology: v5e:2x2
jax: 0.10.0
libtpu: 0.0.40
codegen_flags: <defaults>
</compile_context>

<pallas_src>
import functools

import jax
import jax.numpy as jnp
from jax.experimental import pallas as pl
from jax.experimental.pallas import tpu as pltpu

_LN_EPS = 1e-5
_TARGET_INPUT_BLOCK_BYTES = 2 * 1024 * 1024     # ~2 MiB input tile per grid step
_SINGLE_BUFFER_WEIGHTS_MIN_D = 1024             # single-buffer DxD weights above this


def _round_up(x, m):
    return ((x + m - 1) // m) * m


def _round_down(x, m):
    return (x // m) * m


def _physical_vmem_bytes():
    """Per-TensorCore VMEM; conservative v7x fallback (64 MiB) if unavailable."""
    try:
        return int(pltpu.get_tpu_info().vmem_capacity_bytes)
    except Exception:
        return 64 * 1024 * 1024


def _choose_row_tile(N, D, in_itemsize, weight_bufs, vmem_budget, block_rows):
    """Pick the row tile (multiple of 128 when tiled) for the flattened input."""
    if N <= 128:
        # Single block covering all rows (rows padded to a sublane multiple of 8).
        return _round_up(max(N, 1), 8)

    if block_rows is not None:
        tm = _round_up(block_rows, 128)
    else:
        # Byte-targeted tile: amortize the ~0.35 us/step pipeline overhead.
        tm = max(512, _round_up(_TARGET_INPUT_BLOCK_BYTES // (in_itemsize * D), 128))

    # Guarantee >= 2 grid steps when N allows, so "parallel" row tiles can be
    # split across v7x's two TensorCores (harmless single extra step elsewhere).
    cap_n = _round_down(N // 2, 128) if N >= 256 else 128
    tm = min(tm, max(cap_n, 128))

    # Explicit VMEM byte estimate: clamp tm so it fits the budget.
    fixed = weight_bufs * 2 * (D * D * 2)      # two DxD bf16 weight buffers
    fixed += 2 * (8 * D * 4)                   # packed f32 param rows (dbl-buffered)
    per_row = 2 * D * in_itemsize              # input tile, double-buffered
    per_row += 2 * 4                           # lane-dense output row, double-buffered
    per_row += 3 * D * 4                       # live f32 intermediates (h, scale, shift)
    cap_v = _round_down(max(vmem_budget - fixed, 0) // per_row, 128)
    if cap_v >= 128:
        tm = min(tm, cap_v)
    return max(tm, 128)


def _termination_decoder_kernel(
    x_ref,      # (TM, D)  f32/bf16  input rows
    w1_ref,     # (D, D)   bf16      backbone linear 1 (no bias)
    w2_ref,     # (D, D)   bf16      backbone linear 2 (no bias)
    p_ref,      # (8, D)   f32       rows: g1, b1, g2, b2, w_head, pad, pad, pad
    bh_ref,     # (1, 1)   f32       head bias (SMEM scalar)
    o_ref,      # (1, TM)  f32       output logits, lane-dense
):
    def ln_relu(h, g, b):
        # One-pass LayerNorm statistics (biased variance, eps inside rsqrt --
        # matches PyTorch) + ReLU, all in f32.  sum / sum-of-squares are
        # computed together (no serial mean -> (h-mean) -> var dependency);
        # gamma*rsqrt folds into a single scale and (beta - mean*scale) shift.
        s1 = jnp.mean(h, axis=-1, keepdims=True)
        s2 = jnp.mean(h * h, axis=-1, keepdims=True)
        var = jnp.maximum(s2 - s1 * s1, 0.0)
        scale = g * jax.lax.rsqrt(var + _LN_EPS)
        shift = b - s1 * scale
        return jnp.maximum(h * scale + shift, 0.0)

    g1 = p_ref[0:1, :]
    b1 = p_ref[1:2, :]
    g2 = p_ref[2:3, :]
    b2 = p_ref[3:4, :]
    wh = p_ref[4:5, :]

    # Block 1: Linear(D,D) [bf16 MXU, f32 accumulate] -> LayerNorm -> ReLU.
    x = x_ref[...].astype(jnp.bfloat16)
    h = jnp.dot(x, w1_ref[...], preferred_element_type=jnp.float32)
    h = ln_relu(h, g1, b1)

    # Block 2: Linear(D,D) [bf16 MXU, f32 accumulate] -> LayerNorm -> ReLU.
    h = jnp.dot(h.astype(jnp.bfloat16), w2_ref[...],
                preferred_element_type=jnp.float32)
    h = ln_relu(h, g2, b2)

    # Head: Linear(D, 1) + bias as a VPU multiply + XLU lane reduction (a
    # (TM,D)@(D,1) matmul would waste a padded MXU pass and force a masked
    # (TM,1) store).  Stored lane-dense as a (1, TM) row; the sublane->lane
    # relayout of the reduction result is a handful of XLU ops per tile.
    head = jnp.sum(h * wh, axis=-1)                          # (TM,)
    o_ref[...] = (head[None, :] + bh_ref[0, 0]).astype(o_ref.dtype)


@functools.partial(jax.jit, static_argnames=("block_rows",))
def termination_decoder(feat, params, *, block_rows=None):
    """feat: (B, L, D) float32 or bfloat16.  Returns termination logits (B, L) f32.

    Passing bf16 feat halves input HBM traffic (the kernel casts to bf16 for the
    MXU either way).  block_rows optionally overrides the byte-targeted row tile.
    """
    B, L, D = feat.shape
    N = B * L
    x = feat.reshape(N, D)
    in_itemsize = jnp.dtype(feat.dtype).itemsize

    # ---- generation-aware VMEM budget ---------------------------------------
    phys_vmem = _physical_vmem_bytes()
    vmem_limit = max(min(phys_vmem * 7 // 8, 100 * 1024 * 1024), 48 * 1024 * 1024)
    vmem_budget = vmem_limit - 8 * 1024 * 1024       # headroom for compiler scratch

    single_buffer_w = D >= _SINGLE_BUFFER_WEIGHTS_MIN_D
    weight_bufs = 1 if single_buffer_w else 2

    # ---- effective row tile --------------------------------------------------
    tm_eff = _choose_row_tile(N, D, in_itemsize, weight_bufs, vmem_budget, block_rows)
    if N <= 128 and tm_eff != N:
        x = jnp.pad(x, ((0, tm_eff - N), (0, 0)))
    grid = pl.cdiv(N, tm_eff)
    n_out = grid * tm_eff

    # bf16 weights for the MXU (f32 accumulation in-kernel); LayerNorm / head
    # parameters stay f32, packed into a single (8, D) block.
    w1 = params["w1"].astype(jnp.bfloat16)
    w2 = params["w2"].astype(jnp.bfloat16)
    packed = jnp.concatenate(
        [params["g1"].reshape(1, D), params["b1"].reshape(1, D),
         params["g2"].reshape(1, D), params["b2"].reshape(1, D),
         params["wh"].reshape(1, D), jnp.zeros((3, D), jnp.float32)],
        axis=0).astype(jnp.float32)
    bh = params["bh"].reshape(1, 1).astype(jnp.float32)

    # Constant index_map => weights are DMA'd once.  Above the D threshold,
    # single-buffer them (double-buffering a resident block buys nothing and
    # would eat v7x's 64 MiB VMEM at large D).
    if single_buffer_w:
        w_spec = pl.BlockSpec((D, D), lambda i: (0, 0), pipeline_mode=pl.Buffered(1))
    else:
        w_spec = pl.BlockSpec((D, D), lambda i: (0, 0))

    out = pl.pallas_call(
        _termination_decoder_kernel,
        out_shape=jax.ShapeDtypeStruct((1, n_out), jnp.float32),
        grid_spec=pltpu.PrefetchScalarGridSpec(
            num_scalar_prefetch=0,
            grid=(grid,),
            in_specs=[
                pl.BlockSpec((tm_eff, D), lambda i: (i, 0)),       # x rows
                w_spec,                                            # w1 (bf16)
                w_spec,                                            # w2 (bf16)
                pl.BlockSpec((8, D), lambda i: (0, 0)),            # packed params
                pl.BlockSpec(memory_space=pltpu.MemorySpace.SMEM), # head bias scalar
            ],
            # Lane-dense output: one (1, tm_eff) row of logits per grid step.
            out_specs=pl.BlockSpec((1, tm_eff), lambda i: (0, i)),
        ),
        compiler_params=pltpu.CompilerParams(
            # "parallel" row tiles shard across TensorCores on v7x (2 TC/chip);
            # it is a no-op on single-TC v5e/v6e.
            dimension_semantics=("parallel",),
            vmem_limit_bytes=vmem_limit,
        ),
    )(x, w1, w2, packed, bh)

    return out[0, :N].reshape(B, L)


def init_params(key, D):
    """Deterministic synthetic parameters matching the nn.Module shapes.

    x @ W here corresponds to PyTorch's x @ weight.T; we store the (in, out)
    matrices the kernel consumes directly.
    """
    k1, k2, k3, k4, k5, k6, k7 = jax.random.split(key, 7)
    scale = 1.0 / jnp.sqrt(D)
    return {
        "w1": jax.random.normal(k1, (D, D), jnp.float32) * scale,
        "g1": 1.0 + 0.1 * jax.random.normal(k2, (1, D), jnp.float32),
        "b1": 0.1 * jax.random.normal(k3, (1, D), jnp.float32),
        "w2": jax.random.normal(k4, (D, D), jnp.float32) * scale,
        "g2": 1.0 + 0.1 * jax.random.normal(k5, (1, D), jnp.float32),
        "b2": 0.1 * jax.random.normal(k6, (1, D), jnp.float32),
        "wh": jax.random.normal(k7, (D, 1), jnp.float32) * scale,
        "bh": jnp.zeros((1, 1), jnp.float32),
    }


def _ln_onepass(h, g, b):
    """Exact model of the kernel's one-pass LayerNorm arithmetic."""
    s1 = jnp.mean(h, axis=-1, keepdims=True)
    s2 = jnp.mean(h * h, axis=-1, keepdims=True)
    var = jnp.maximum(s2 - s1 * s1, 0.0)
    scale = g * jax.lax.rsqrt(var + _LN_EPS)
    return h * scale + (b - s1 * scale)


def _reference_kernel_precision(feat, params):
    """Pure-JAX model of the kernel's exact arithmetic (bf16 MXU matmuls,
    f32 accumulation / one-pass LayerNorm / head)."""
    w1 = params["w1"].astype(jnp.bfloat16)
    w2 = params["w2"].astype(jnp.bfloat16)
    h = jnp.dot(feat.astype(jnp.bfloat16), w1, preferred_element_type=jnp.float32)
    h = jnp.maximum(_ln_onepass(h, params["g1"], params["b1"]), 0.0)
    h = jnp.dot(h.astype(jnp.bfloat16), w2, preferred_element_type=jnp.float32)
    h = jnp.maximum(_ln_onepass(h, params["g2"], params["b2"]), 0.0)
    wh = params["wh"].reshape(1, 1, -1)
    return jnp.sum(h * wh, axis=-1) + params["bh"][0, 0]


def _ln_fp32(h, g, b):
    m = jnp.mean(h, axis=-1, keepdims=True)
    v = jnp.mean((h - m) ** 2, axis=-1, keepdims=True)
    return (h - m) * jax.lax.rsqrt(v + _LN_EPS) * g + b


def _reference_fp32(feat, params):
    """Strict f32 forward of the PyTorch module (for bf16-error sanity check)."""
    hi = jax.lax.Precision.HIGHEST
    h = jnp.maximum(_ln_fp32(jnp.dot(feat, params["w1"], precision=hi),
                             params["g1"], params["b1"]), 0.0)
    h = jnp.maximum(_ln_fp32(jnp.dot(h, params["w2"], precision=hi),
                             params["g2"], params["b2"]), 0.0)
    out = jnp.dot(h, params["wh"], precision=hi) + params["bh"]
    return out[..., 0]


if __name__ == "__main__":
    D = 128  # transformer_hidden_dim
    key = jax.random.PRNGKey(0)
    k_feat, k_params, k_feat2 = jax.random.split(key, 3)
    params = init_params(k_params, D)

    # --- small case: single-block path (N <= 128) -----------------------------
    B, L = 2, 8
    feat = jax.random.normal(k_feat, (B, L, D), jnp.float32)
    out = jax.block_until_ready(termination_decoder(feat, params))
    assert out.shape == (B, L), out.shape

    ref_same = _reference_kernel_precision(feat, params)
    err_same = float(jnp.max(jnp.abs(out - ref_same)))
    assert jnp.allclose(out, ref_same, atol=2e-3, rtol=2e-3), err_same

    ref_f32 = _reference_fp32(feat, params)
    err_f32 = float(jnp.max(jnp.abs(out - ref_f32)))
    assert jnp.allclose(out, ref_f32, atol=1e-1, rtol=1e-1), err_f32

    # --- tiled path: multiple row blocks with a ragged trailing block ---------
    B2, L2 = 2, 250   # N = 500 -> tm = 128, grid = 4 (last block partial)
    feat2 = jax.random.normal(k_feat2, (B2, L2, D), jnp.float32)
    out2 = jax.block_until_ready(termination_decoder(feat2, params))
    assert out2.shape == (B2, L2), out2.shape

    ref2 = _reference_kernel_precision(feat2, params)
    err2 = float(jnp.max(jnp.abs(out2 - ref2)))
    assert jnp.allclose(out2, ref2, atol=2e-3, rtol=2e-3), err2

    print("KERNEL_OK")
</pallas_src>

<mosaic_0001>
module attributes {stable_mosaic.version = 11 : i64} {
  func.func @_termination_decoder_kernel(%arg0: i32, %arg1: memref<16x128xf32, #tpu.memory_space<vmem>>, %arg2: memref<128x128xbf16, #tpu.memory_space<vmem>>, %arg3: memref<128x128xbf16, #tpu.memory_space<vmem>>, %arg4: memref<8x128xf32, #tpu.memory_space<vmem>>, %arg5: memref<1x1xf32, #tpu.memory_space<smem>>, %arg6: memref<1x16xf32, #tpu.memory_space<vmem>>) attributes {dimension_semantics = [#tpu.dimension_semantics<parallel>], iteration_bounds = array<i64: 1>, scalar_prefetch = 0 : i64, scratch_operands = 0 : i64, tpu.core_type = #tpu.core_type<tc>, window_params = [{transform_indices = @transform_0, window_bounds = array<i64: 16, 128>}, {pipeline_mode = #tpu.pipeline_mode<synchronous>, transform_indices = @transform_1, window_bounds = array<i64: 128, 128>}, {pipeline_mode = #tpu.pipeline_mode<synchronous>, transform_indices = @transform_2, window_bounds = array<i64: 128, 128>}, {pipeline_mode = #tpu.pipeline_mode<synchronous>, transform_indices = @transform_3, window_bounds = array<i64: 8, 128>}, {transform_indices = @transform_4, window_bounds = array<i64: 1, 1>}, {transform_indices = @transform_5, window_bounds = array<i64: 1, 16>}]} {
    %c0 = arith.constant 0 : index
    %c0_0 = arith.constant 0 : index
    %0 = vector.load %arg4[%c0, %c0_0] : memref<8x128xf32, #tpu.memory_space<vmem>>, vector<1x128xf32>
    %c1 = arith.constant 1 : index
    %c0_1 = arith.constant 0 : index
    %1 = vector.load %arg4[%c1, %c0_1] : memref<8x128xf32, #tpu.memory_space<vmem>>, vector<1x128xf32>
    %c2 = arith.constant 2 : index
    %c0_2 = arith.constant 0 : index
    %2 = vector.load %arg4[%c2, %c0_2] : memref<8x128xf32, #tpu.memory_space<vmem>>, vector<1x128xf32>
    %c3 = arith.constant 3 : index
    %c0_3 = arith.constant 0 : index
    %3 = vector.load %arg4[%c3, %c0_3] : memref<8x128xf32, #tpu.memory_space<vmem>>, vector<1x128xf32>
    %c4 = arith.constant 4 : index
    %c0_4 = arith.constant 0 : index
    %4 = vector.load %arg4[%c4, %c0_4] : memref<8x128xf32, #tpu.memory_space<vmem>>, vector<1x128xf32>
    %c0_5 = arith.constant 0 : index
    %c0_6 = arith.constant 0 : index
    %5 = vector.load %arg1[%c0_5, %c0_6] : memref<16x128xf32, #tpu.memory_space<vmem>>, vector<16x128xf32>
    %6 = arith.truncf %5 : vector<16x128xf32> to vector<16x128xbf16>
    %c0_7 = arith.constant 0 : index
    %c0_8 = arith.constant 0 : index
    %7 = vector.load %arg2[%c0_7, %c0_8] : memref<128x128xbf16, #tpu.memory_space<vmem>>, vector<128x128xbf16>
    %cst = arith.constant dense<0.000000e+00> : vector<16x128xf32>
    %8 = tpu.matmul %6, %7, %cst {dimension_numbers = #tpu.dot_dimension_numbers<[1], [0], [0], [1], [0, 0, 1, 1], [], []>} : vector<16x128xbf16>, vector<128x128xbf16>, vector<16x128xf32> -> vector<16x128xf32>
    %cst_9 = arith.constant dense<0.000000e+00> : vector<16xf32>
    %9 = vector.multi_reduction <add>, %8, %cst_9 [1] : vector<16x128xf32> to vector<16xf32>
    %10 = vector.shape_cast %9 : vector<16xf32> to vector<16x1xf32>
    %cst_10 = arith.constant 1.280000e+02 : f32
    %11 = vector.broadcast %cst_10 : f32 to vector<16x1xf32>
    %12 = arith.divf %10, %11 : vector<16x1xf32>
    %13 = arith.mulf %8, %8 : vector<16x128xf32>
    %cst_11 = arith.constant dense<0.000000e+00> : vector<16xf32>
    %14 = vector.multi_reduction <add>, %13, %cst_11 [1] : vector<16x128xf32> to vector<16xf32>
    %15 = vector.shape_cast %14 : vector<16xf32> to vector<16x1xf32>
    %cst_12 = arith.constant 1.280000e+02 : f32
    %16 = vector.broadcast %cst_12 : f32 to vector<16x1xf32>
    %17 = arith.divf %15, %16 : vector<16x1xf32>
    %18 = arith.mulf %12, %12 : vector<16x1xf32>
    %19 = arith.subf %17, %18 : vector<16x1xf32>
    %cst_13 = arith.constant 0.000000e+00 : f32
    %20 = vector.broadcast %cst_13 : f32 to vector<16x1xf32>
    %21 = arith.maximumf %19, %20 : vector<16x1xf32>
    %cst_14 = arith.constant 9.99999974E-6 : f32
    %22 = vector.broadcast %cst_14 : f32 to vector<16x1xf32>
    %23 = arith.addf %21, %22 : vector<16x1xf32>
    %24 = math.rsqrt %23 : vector<16x1xf32>
    %25 = vector.broadcast %0 : vector<1x128xf32> to vector<16x128xf32>
    %26 = vector.broadcast %24 : vector<16x1xf32> to vector<16x128xf32>
    %27 = arith.mulf %25, %26 : vector<16x128xf32>
    %28 = vector.broadcast %12 : vector<16x1xf32> to vector<16x128xf32>
    %29 = arith.mulf %28, %27 : vector<16x128xf32>
    %30 = vector.broadcast %1 : vector<1x128xf32> to vector<16x128xf32>
    %31 = arith.subf %30, %29 : vector<16x128xf32>
    %32 = arith.mulf %8, %27 : vector<16x128xf32>
    %33 = arith.addf %32, %31 : vector<16x128xf32>
    %cst_15 = arith.constant 0.000000e+00 : f32
    %34 = vector.broadcast %cst_15 : f32 to vector<16x128xf32>
    %35 = arith.maximumf %33, %34 : vector<16x128xf32>
    %36 = arith.truncf %35 : vector<16x128xf32> to vector<16x128xbf16>
    %c0_16 = arith.constant 0 : index
    %c0_17 = arith.constant 0 : index
    %37 = vector.load %arg3[%c0_16, %c0_17] : memref<128x128xbf16, #tpu.memory_space<vmem>>, vector<128x128xbf16>
    %cst_18 = arith.constant dense<0.000000e+00> : vector<16x128xf32>
    %38 = tpu.matmul %36, %37, %cst_18 {dimension_numbers = #tpu.dot_dimension_numbers<[1], [0], [0], [1], [0, 0, 1, 1], [], []>} : vector<16x128xbf16>, vector<128x128xbf16>, vector<16x128xf32> -> vector<16x128xf32>
    %cst_19 = arith.constant dense<0.000000e+00> : vector<16xf32>
    %39 = vector.multi_reduction <add>, %38, %cst_19 [1] : vector<16x128xf32> to vector<16xf32>
    %40 = vector.shape_cast %39 : vector<16xf32> to vector<16x1xf32>
    %cst_20 = arith.constant 1.280000e+02 : f32
    %41 = vector.broadcast %cst_20 : f32 to vector<16x1xf32>
    %42 = arith.divf %40, %41 : vector<16x1xf32>
    %43 = arith.mulf %38, %38 : vector<16x128xf32>
    %cst_21 = arith.constant dense<0.000000e+00> : vector<16xf32>
    %44 = vector.multi_reduction <add>, %43, %cst_21 [1] : vector<16x128xf32> to vector<16xf32>
    %45 = vector.shape_cast %44 : vector<16xf32> to vector<16x1xf32>
    %cst_22 = arith.constant 1.280000e+02 : f32
    %46 = vector.broadcast %cst_22 : f32 to vector<16x1xf32>
    %47 = arith.divf %45, %46 : vector<16x1xf32>
    %48 = arith.mulf %42, %42 : vector<16x1xf32>
    %49 = arith.subf %47, %48 : vector<16x1xf32>
    %cst_23 = arith.constant 0.000000e+00 : f32
    %50 = vector.broadcast %cst_23 : f32 to vector<16x1xf32>
    %51 = arith.maximumf %49, %50 : vector<16x1xf32>
    %cst_24 = arith.constant 9.99999974E-6 : f32
    %52 = vector.broadcast %cst_24 : f32 to vector<16x1xf32>
    %53 = arith.addf %51, %52 : vector<16x1xf32>
    %54 = math.rsqrt %53 : vector<16x1xf32>
    %55 = vector.broadcast %2 : vector<1x128xf32> to vector<16x128xf32>
    %56 = vector.broadcast %54 : vector<16x1xf32> to vector<16x128xf32>
    %57 = arith.mulf %55, %56 : vector<16x128xf32>
    %58 = vector.broadcast %42 : vector<16x1xf32> to vector<16x128xf32>
    %59 = arith.mulf %58, %57 : vector<16x128xf32>
    %60 = vector.broadcast %3 : vector<1x128xf32> to vector<16x128xf32>
    %61 = arith.subf %60, %59 : vector<16x128xf32>
    %62 = arith.mulf %38, %57 : vector<16x128xf32>
    %63 = arith.addf %62, %61 : vector<16x128xf32>
    %cst_25 = arith.constant 0.000000e+00 : f32
    %64 = vector.broadcast %cst_25 : f32 to vector<16x128xf32>
    %65 = arith.maximumf %63, %64 : vector<16x128xf32>
    %66 = vector.broadcast %4 : vector<1x128xf32> to vector<16x128xf32>
    %67 = arith.mulf %65, %66 : vector<16x128xf32>
    %cst_26 = arith.constant dense<0.000000e+00> : vector<16xf32>
    %68 = vector.multi_reduction <add>, %67, %cst_26 [1] : vector<16x128xf32> to vector<16xf32>
    %69 = vector.shape_cast %68 : vector<16xf32> to vector<1x16xf32>
    %c0_27 = arith.constant 0 : index
    %c0_28 = arith.constant 0 : index
    %70 = memref.load %arg5[%c0_27, %c0_28] : memref<1x1xf32, #tpu.memory_space<smem>>
    %71 = vector.broadcast %70 : f32 to vector<1x16xf32>
    %72 = arith.addf %69, %71 : vector<1x16xf32>
    %c0_29 = arith.constant 0 : index
    %c0_30 = arith.constant 0 : index
    %73 = vector.load %arg6[%c0_29, %c0_30] : memref<1x16xf32, #tpu.memory_space<vmem>>, vector<1x16xf32>
    tpu.vector_store %arg6[%c0_29, %c0_30], %72 {strides = array<i32>} : memref<1x16xf32, #tpu.memory_space<vmem>>, vector<1x16xf32>,
    return
  }
  func.func @transform_0(%arg0: i32) -> (i32, i32) {
    %c0_i32 = arith.constant 0 : i32
    %c0_i32_0 = arith.constant 0 : i32
    return %arg0, %c0_i32 : i32, i32
  }
  func.func @transform_1(%arg0: i32) -> (i32, i32) {
    %c0_i32 = arith.constant 0 : i32
    %c0_i32_0 = arith.constant 0 : i32
    %c0_i32_1 = arith.constant 0 : i32
    return %c0_i32, %c0_i32_0 : i32, i32
  }
  func.func @transform_2(%arg0: i32) -> (i32, i32) {
    %c0_i32 = arith.constant 0 : i32
    %c0_i32_0 = arith.constant 0 : i32
    %c0_i32_1 = arith.constant 0 : i32
    return %c0_i32, %c0_i32_0 : i32, i32
  }
  func.func @transform_3(%arg0: i32) -> (i32, i32) {
    %c0_i32 = arith.constant 0 : i32
    %c0_i32_0 = arith.constant 0 : i32
    %c0_i32_1 = arith.constant 0 : i32
    return %c0_i32, %c0_i32_0 : i32, i32
  }
  func.func @transform_4(%arg0: i32) -> (i32, i32) {
    %c0_i32 = arith.constant 0 : i32
    %c0_i32_0 = arith.constant 0 : i32
    %c0_i32_1 = arith.constant 0 : i32
    return %c0_i32, %c0_i32_0 : i32, i32
  }
  func.func @transform_5(%arg0: i32) -> (i32, i32) {
    %c0_i32 = arith.constant 0 : i32
    %c0_i32_0 = arith.constant 0 : i32
    return %c0_i32, %arg0 : i32, i32
  }
}

</mosaic_0001>

<bundles_post_ra>
// kernel: squeeze.1
= control target key start
LH: loop header
LB: loop body
LE: loop exit
PB: predicated region body
PF: predicated region fallthrough
CT: control target
= control target key end

     0   :  { %s80_s0 = inlined_call_operand.vmem [shape: f32[16], index: 0, kind: input, shape index: {}]   ;;  %s81_s1 = inlined_call_operand.hbm [shape: f32[2,8], index: 1, kind: output, shape index: {}]  }
   0x1   :  { %v5_v0 = vld [vmem:[%s80_s0] sm:$0x1] }
   0x2   :  { %2 = vsyncpa [#allocation1], 0  ;;  %6 = vst [vmem:[#allocation3] sm:$0x1] %v5_v0  ;;  %vm8_vm0 = vcmask 64512   ;;  %s62_s0 = smov 120  }
   0x3   :  { %s63_s8 = smov [#allocation0]   ;;  %s27_s1 = sshll.u32 %s81_s1, 4  ;;  %s28_s1 = int_to_ptr.hbm [resolvable:$true] %s27_s1 }
   0x4   :  { %s25_s9 = sshll.u32 %s63_s8, 4  ;;  %s26_s9 = int_to_ptr.vmem [resolvable:$true] %s25_s9 }
   0x9   :  { %v10_v1 = vld [vmem:[#allocation3] sm:$0x1]  }
   0xa   :  { %v7_v2 = vld [vmem:[#allocation3] sm:$0x1]   ;;  %11 = vrot.lane.b32.xlu0 %v10_v1, %s62_s0 }
   0xb   :  { %9 = vst.msk [vmem:[#allocation2] sm:$0x1] %vm8_vm0, %v7_v2  }
  0x7c   :  { %v12_v3 = vpop.permute.xlu0 %11  }
  0x7d   :  { %15 = vst.msk [vmem:[#allocation2 + $0x1] sm:$0x1] %vm8_vm0, %v12_v3  }
  0x84   :  { %v18_v4 = vld [vmem:[#allocation2] sm:$0x3] }
  0x85   :  { %21 = vst [vmem:[#allocation0] sm:$0x3] %v18_v4 }
  0x86   :  { %30 = dma.vmem_to_hbm [thread:$0]  %s26_s9, 32, %s28_s1, [#allocation1]  }
  0x87   :  { %60 = dma.done.wait [#allocation1], 32  }
  0x88   :  { %61 = vsyncadd [#allocation1], 4294967264 }
  0x89   :  { %33 = vsyncpa [#allocation1], 1 }

// kernel: termination_decoder.1
= control target key start
LH: loop header
LB: loop body
LE: loop exit
PB: predicated region body
PF: predicated region fallthrough
CT: control target
= control target key end

     0   :  { %v428_v15 = vmov 128.0   ;;  %vm323_vm13 = vcmask 130112   ;;  %vm326_vm14 = vcmask 122880   ;;  %s556_s1 = inlined_call_operand.vmem [shape: bf16[128,128], index: 1, kind: input, shape index: {}]   ;;  %s557_s0 = inlined_call_operand.vmem [shape: f32[16,128], index: 0, kind: input, shape index: {}]   ;;  %s558_s3 = inlined_call_operand.vmem [shape: f32[8,128], index: 3, kind: input, shape index: {}]   ;;  %s559_s2 = inlined_call_operand.vmem [shape: bf16[128,128], index: 2, kind: input, shape index: {}]   ;;  %s560_s4 = inlined_call_operand.<no memory space> [shape: f32[1,1], index: 4, kind: input, shape index: {}]   ;;  %s561_s5 = inlined_call_operand.vmem [shape: f32[1,16], index: 5, kind: output, shape index: {}]  }
   0x1   :  { %v403_v0 = vld [vmem:[%s556_s1 + $0x38] sm:$0xff]  ;;  %v402_v1 = vld [vmem:[%s556_s1 + $0x30] sm:$0xff]  ;;  %v401_v2 = vld [vmem:[%s556_s1 + $0x28] sm:$0xff]  ;;  %418 = vrcp.f32 %v428_v15 }
   0x2   :  { %93 = vmatpush.bf16.msra.mxu0 %v403_v0  ;;  %v400_v3 = vld [vmem:[%s556_s1 + $0x20] sm:$0xff]  ;;  %v399_v4 = vld [vmem:[%s556_s1 + $0x18] sm:$0xff]  ;;  %v398_v5 = vld [vmem:[%s556_s1 + $0x10] sm:$0xff] }
   0x3   :  { %v397_v6 = vld [vmem:[%s556_s1 + $0x8] sm:$0xff]  ;;  %v396_v7 = vld [vmem:[%s556_s1] sm:$0xff]  ;;  %v411_v18 = vld [vmem:[%s559_s2 + $0x38] sm:$0xff] }
   0x4   :  { %v26_v8 = vld [vmem:[%s557_s0] sm:$0xff]  ;;  %v27_v9 = vld [vmem:[%s557_s0 + $0x8] sm:$0xff]  ;;  %235 = vmatpush.bf16.msra.mxu1 %v411_v18  ;;  %v410_v20 = vld [vmem:[%s559_s2 + $0x30] sm:$0xff] }
   0x5   :  { %v28_v10 = vpack.c.bf16 %v27_v9, %v26_v8  ;;  %v409_v22 = vld [vmem:[%s559_s2 + $0x28] sm:$0xff]  ;;  %v408_v24 = vld [vmem:[%s559_s2 + $0x20] sm:$0xff]  ;;  %v407_v27 = vld [vmem:[%s559_s2 + $0x18] sm:$0xff] }
   0x6   :  { %94 = vmatpush.bf16.msra.mxu0 %v402_v1  ;;  %v406_v30 = vld [vmem:[%s559_s2 + $0x10] sm:$0xff]  ;;  %v405_v34 = vld [vmem:[%s559_s2 + $0x8] sm:$0xff]  ;;  %v404_v40 = vld [vmem:[%s559_s2] sm:$0xff] }
   0x7   :  { %v419_v16 = vpop.eup %418  ;;  %v413_v52 = vld [vmem:[%s558_s3] ss:$0 sm:$0xff]  ;;  %v414_v61 = vld [vmem:[%s558_s3 + $0x1] ss:$0 sm:$0xff] }
   0x8   :  { %v112_v17 = vmul.f32 128.0, %v419_v16  ;;  %236 = vmatpush.bf16.msra.mxu1 %v410_v20  ;;  %vm116_vm0 = vweird.f32 %v419_v16 }
   0xa   :  { %95 = vmatpush.bf16.msra.mxu0 %v401_v2  ;;  %v113_v19 = vsub.f32 1.0, %v112_v17 }
   0xc   :  { %v114_v21 = vmul.f32 %v419_v16, %v113_v19  ;;  %237 = vmatpush.bf16.msra.mxu1 %v409_v22 }
   0xe   :  { %96 = vmatpush.bf16.msra.mxu0 %v400_v3  ;;  %v115_v23 = vadd.f32 %v419_v16, %v114_v21 }
  0x10   :  { %v511_v25 = vsel %vm116_vm0, %v419_v16, %v115_v23  ;;  %238 = vmatpush.bf16.msra.mxu1 %v408_v24 }
  0x12   :  { %97 = vmatpush.bf16.msra.mxu0 %v399_v4 }
  0x14   :  { %239 = vmatpush.bf16.msra.mxu1 %v407_v27 }
  0x16   :  { %98 = vmatpush.bf16.msra.mxu0 %v398_v5 }
  0x18   :  { %240 = vmatpush.bf16.msra.mxu1 %v406_v30 }
  0x1a   :  { %99 = vmatpush.bf16.msra.mxu0 %v397_v6 }
  0x1c   :  { %241 = vmatpush.bf16.msra.mxu1 %v405_v34 }
  0x1e   :  { %100 = vmatpush.bf16.msra.mxu0 %v396_v7 }
  0x20   :  { %242 = vmatpush.bf16.msra.mxu1 %v404_v40 }
  0x21   :  { %101 = vmatmul.bf16.vlgmr.msra.gmra.mxu0 %v28_v10 }
  0x9e   :  { %v489_v11 = vpop.f32.mrf.mxu0 }
  0x9f   :  { %107 = vadd.xlane.f32.xlu0 %v489_v11  ;;  %v120_v12 = vmul.f32 %v489_v11, %v489_v11 }
  0xa1   :  { %122 = vadd.xlane.f32.xlu1 %v120_v12 }
  0xa6   :  { %v494_v13 = vpop.f32.mrf.mxu0 }
  0xa7   :  { %109 = vadd.xlane.f32.xlu0 %v494_v13  ;;  %v121_v14 = vmul.f32 %v494_v13, %v494_v13 }
  0xa9   :  { %124 = vadd.xlane.f32.xlu1 %v121_v14 }
 0x112   :  { %v108_v26 = vpop.xlane.xlu0 %107 }
 0x113   :  { %v118_v28 = vmul.f32 %v511_v25, %v108_v26 }
 0x114   :  { %v123_v29 = vpop.xlane.xlu1 %122 }
 0x115   :  { %v128_v31 = vmul.f32 %v118_v28, %v118_v28  ;;  %v126_v32 = vmul.f32 %v123_v29, %v511_v25 }
 0x117   :  { %v130_v33 = vsub.f32 %v126_v32, %v128_v31 }
 0x119   :  { %v132_v35 = vmax.f32 %v130_v33, 0.0 }
 0x11a   :  { %v110_v36 = vpop.xlane.xlu0 %109 }
 0x11b   :  { %v134_v37 = vadd.f32 1e-05, %v132_v35  ;;  %v119_v38 = vmul.f32 %v511_v25, %v110_v36 }
 0x11c   :  { %v125_v39 = vpop.xlane.xlu1 %124 }
 0x11d   :  { %420 = vrsqrt.f32 %v134_v37  ;;  %v129_v41 = vmul.f32 %v119_v38, %v119_v38  ;;  %v127_v42 = vmul.f32 %v125_v39, %v511_v25  ;;  %vm142_vm2 = vweird.f32 %v134_v37 }
 0x11f   :  { %v131_v43 = vsub.f32 %v127_v42, %v129_v41 }
 0x121   :  { %v133_v44 = vmax.f32 %v131_v43, 0.0  ;;  %v416_v43 = vld [vmem:[%s558_s3 + $0x3] ss:$0 sm:$0xff] }
 0x123   :  { %v421_v45 = vpop.eup %420  ;;  %v135_v46 = vadd.f32 1e-05, %v133_v44 }
 0x124   :  { %v137_v47 = vmul.f32 %v421_v45, %v134_v37  ;;  %vm143_vm1 = vweird.f32 %v421_v45 }
 0x125   :  { %422 = vrsqrt.f32 %v135_v46  ;;  %vm144_vm3 = vmor %vm142_vm2, %vm143_vm1  ;;  %vm152_vm5 = vweird.f32 %v135_v46 }
 0x126   :  { %v138_v48 = vmul.f32 %v421_v45, %v137_v47 }
 0x128   :  { %v139_v49 = vmul.f32 0.5, %v138_v48 }
 0x12a   :  { %v140_v50 = vsub.f32 1.5, %v139_v49 }
 0x12b   :  { %v423_v51 = vpop.eup %422 }
 0x12c   :  { %v141_v53 = vmul.f32 %v421_v45, %v140_v50  ;;  %v147_v54 = vmul.f32 %v423_v51, %v135_v46  ;;  %vm153_vm4 = vweird.f32 %v423_v51 }
 0x12d   :  { %vm154_vm6 = vmor %vm152_vm5, %vm153_vm4 }
 0x12e   :  { %v148_v55 = vmul.f32 %v423_v51, %v147_v54  ;;  %v145_v56 = vsel %vm144_vm3, %v421_v45, %v141_v53 }
 0x12f   :  { %v157_v57 = vmul.f32 %v413_v52, %v145_v56 }
 0x130   :  { %v149_v58 = vmul.f32 0.5, %v148_v55 }
 0x131   :  { %v159_v60 = vmul.f32 %v157_v57, %v118_v28  ;;  %v164_v3 = vmul.f32 %v157_v57, %v489_v11 }
 0x132   :  { %v150_v59 = vsub.f32 1.5, %v149_v58 }
 0x133   :  { %v162_v1 = vsub.f32 %v414_v61, %v159_v60 }
 0x134   :  { %v151_v62 = vmul.f32 %v423_v51, %v150_v59 }
 0x135   :  { %v166_v6 = vadd.f32 %v164_v3, %v162_v1 }
 0x136   :  { %v155_v63 = vsel %vm154_vm6, %v423_v51, %v151_v62  ;;  %v417_v51 = vld [vmem:[%s558_s3 + $0x4] ss:$0 sm:$0xff]  ;;  %v318_v62 = vlaneseq }
 0x137   :  { %v158_v0 = vmul.f32 %v413_v52, %v155_v63  ;;  %v168_v8 = vmax.f32 %v166_v6, 0.0  ;;  %v313_v63 = vstv %s560_s4 }
 0x138   :  { %v319_v1 = vand.u32 127, %v318_v62 }
 0x139   :  { %v160_v2 = vmul.f32 %v158_v0, %v119_v38  ;;  %v165_v5 = vmul.f32 %v158_v0, %v494_v13  ;;  %v415_v38 = vld [vmem:[%s558_s3 + $0x2] ss:$0 sm:$0xff] }
 0x13a   :  { %v321_v3 = vadd.s32 4294967288, %v319_v1 }
 0x13b   :  { %v163_v4 = vsub.f32 %v414_v61, %v160_v2 }
 0x13d   :  { %v167_v7 = vadd.f32 %v165_v5, %v163_v4 }
 0x13f   :  { %v169_v9 = vmax.f32 %v167_v7, 0.0 }
 0x141   :  { %v170_v10 = vpack.c.bf16 %v169_v9, %v168_v8 }
 0x143   :  { %243 = vmatmul.bf16.vlgmr.msra.gmra.mxu1 %v170_v10 }
 0x1c0   :  { %v244_v12 = vpop.f32.mrf.mxu1 }
 0x1c1   :  { %249 = vadd.xlane.f32.xlu2 %v244_v12  ;;  %v255_v14 = vmul.f32 %v244_v12, %v244_v12 }
 0x1c3   :  { %257 = vadd.xlane.f32.xlu0 %v255_v14 }
 0x1c8   :  { %v246_v15 = vpop.f32.mrf.mxu1 }
 0x1c9   :  { %251 = vadd.xlane.f32.xlu2 %v246_v15  ;;  %v256_v16 = vmul.f32 %v246_v15, %v246_v15 }
 0x1cb   :  { %259 = vadd.xlane.f32.xlu1 %v256_v16 }
 0x234   :  { %v250_v17 = vpop.xlane.xlu2 %249 }
 0x235   :  { %v253_v11 = vmul.f32 %v250_v17, %v511_v25 }
 0x236   :  { %v258_v18 = vpop.xlane.xlu0 %257 }
 0x237   :  { %v263_v19 = vmul.f32 %v253_v11, %v253_v11  ;;  %v261_v13 = vmul.f32 %v258_v18, %v511_v25 }
 0x239   :  { %v265_v20 = vsub.f32 %v261_v13, %v263_v19 }
 0x23b   :  { %v267_v21 = vmax.f32 %v265_v20, 0.0 }
 0x23c   :  { %v252_v22 = vpop.xlane.xlu2 %251 }
 0x23d   :  { %v269_v23 = vadd.f32 1e-05, %v267_v21  ;;  %v254_v24 = vmul.f32 %v252_v22, %v511_v25 }
 0x23e   :  { %v260_v26 = vpop.xlane.xlu1 %259 }
 0x23f   :  { %424 = vrsqrt.f32 %v269_v23  ;;  %v264_v27 = vmul.f32 %v254_v24, %v254_v24  ;;  %v262_v28 = vmul.f32 %v260_v26, %v511_v25  ;;  %vm277_vm8 = vweird.f32 %v269_v23 }
 0x241   :  { %v266_v29 = vsub.f32 %v262_v28, %v264_v27 }
 0x243   :  { %v268_v30 = vmax.f32 %v266_v29, 0.0 }
 0x245   :  { %v425_v31 = vpop.eup %424  ;;  %v270_v32 = vadd.f32 1e-05, %v268_v30 }
 0x246   :  { %v272_v33 = vmul.f32 %v425_v31, %v269_v23  ;;  %vm278_vm7 = vweird.f32 %v425_v31 }
 0x247   :  { %426 = vrsqrt.f32 %v270_v32  ;;  %vm279_vm9 = vmor %vm277_vm8, %vm278_vm7  ;;  %vm287_vm11 = vweird.f32 %v270_v32 }
 0x248   :  { %v273_v34 = vmul.f32 %v425_v31, %v272_v33 }
 0x24a   :  { %v274_v35 = vmul.f32 0.5, %v273_v34 }
 0x24c   :  { %v275_v36 = vsub.f32 1.5, %v274_v35 }
 0x24d   :  { %v427_v37 = vpop.eup %426 }
 0x24e   :  { %v276_v39 = vmul.f32 %v425_v31, %v275_v36  ;;  %v282_v40 = vmul.f32 %v427_v37, %v270_v32  ;;  %vm288_vm10 = vweird.f32 %v427_v37 }
 0x24f   :  { %vm289_vm12 = vmor %vm287_vm11, %vm288_vm10 }
 0x250   :  { %v283_v25 = vmul.f32 %v427_v37, %v282_v40  ;;  %v280_v41 = vsel %vm279_vm9, %v425_v31, %v276_v39 }
 0x251   :  { %v292_v42 = vmul.f32 %v415_v38, %v280_v41 }
 0x252   :  { %v284_v44 = vmul.f32 0.5, %v283_v25 }
 0x253   :  { %v294_v45 = vmul.f32 %v292_v42, %v253_v11  ;;  %v299_v48 = vmul.f32 %v292_v42, %v244_v12 }
 0x254   :  { %v285_v46 = vsub.f32 1.5, %v284_v44 }
 0x255   :  { %v297_v47 = vsub.f32 %v416_v43, %v294_v45 }
 0x256   :  { %v286_v49 = vmul.f32 %v427_v37, %v285_v46 }
 0x257   :  { %v301_v50 = vadd.f32 %v299_v48, %v297_v47 }
 0x258   :  { %v290_v52 = vsel %vm289_vm12, %v427_v37, %v286_v49 }
 0x259   :  { %v303_v53 = vmax.f32 %v301_v50, 0.0  ;;  %v293_v54 = vmul.f32 %v415_v38, %v290_v52 }
 0x25b   :  { %v306_v55 = vmul.f32 %v417_v51, %v303_v53  ;;  %v295_v56 = vmul.f32 %v293_v54, %v254_v24  ;;  %v300_v58 = vmul.f32 %v293_v54, %v246_v15 }
 0x25d   :  { %308 = vadd.xlane.f32.xlu2 %v306_v55  ;;  %v298_v57 = vsub.f32 %v416_v43, %v295_v56 }
 0x25f   :  { %v302_v59 = vadd.f32 %v300_v58, %v298_v57 }
 0x261   :  { %v304_v60 = vmax.f32 %v302_v59, 0.0 }
 0x263   :  { %v307_v61 = vmul.f32 %v417_v51, %v304_v60 }
 0x265   :  { %310 = vadd.xlane.f32.xlu0 %v307_v61 }
 0x2d0   :  { %v309_v0 = vpop.xlane.xlu2 %308 }
 0x2d1   :  { %v314_v2 = vadd.f32 %v313_v63, %v309_v0 }
 0x2d3   :  { %v320_v6 = vperm.slane %v314_v2, %v319_v1 }
 0x2d8   :  { %v311_v4 = vpop.xlane.xlu0 %310 }
 0x2d9   :  { %v315_v5 = vadd.f32 %v313_v63, %v311_v4 }
 0x2db   :  { %v322_v7 = vperm.slane %v315_v5, %v321_v3 }
 0x2dd   :  { %v324_v8 = vsel %vm323_vm13, %v322_v7, %v320_v6 }
 0x2de   :  { %327 = vst.msk [vmem:[%s561_s5] sm:$0x1] %vm326_vm14, %v324_v8 }

</bundles_post_ra>
